<compile_context>
chip_gen: v7x
topology: tpu7x:2x2x1
jax: 0.10.0
libtpu: 0.0.40
codegen_flags: <defaults>
</compile_context>

<pallas_src>
import functools
import math

import jax
import jax.numpy as jnp
from jax import lax
from jax.experimental import pallas as pl
from jax.experimental.pallas import tpu as pltpu


def _round_up(x, m):
    return ((x + m - 1) // m) * m


def _cdiv(a, b):
    return (a + b - 1) // b


# ---------------------------------------------------------------------------
# Kernel body: (tm, K) patch tile @ (K, tn) weight tile (+ bias slice).
# ---------------------------------------------------------------------------
def _patch_embed_kernel(x_ref, w_ref, b_ref, o_ref):
    acc = jnp.dot(x_ref[...], w_ref[...], preferred_element_type=jnp.float32)
    # Bias add rides the VPU while the MXU drains; stay in f32, cast on store.
    o_ref[...] = (acc + b_ref[...]).astype(o_ref.dtype)


def _probe_copy_kernel(x_ref, o_ref):
    o_ref[...] = x_ref[...]


@functools.lru_cache(maxsize=1)
def _single_buffer_supported():
    """True iff this jax/Mosaic build accepts pl.Buffered(1) as a BlockSpec
    pipeline_mode (used to single-buffer the grid-invariant weight/bias)."""
    try:
        f = pl.pallas_call(
            _probe_copy_kernel,
            out_shape=jax.ShapeDtypeStruct((16, 128), jnp.float32),
            grid=(2, 1),
            in_specs=[pl.BlockSpec((8, 128), lambda i, j: (0, 0),
                                   pipeline_mode=pl.Buffered(1))],
            out_specs=pl.BlockSpec((8, 128), lambda i, j: (i, 0)),
        )
        jax.block_until_ready(f(jnp.zeros((8, 128), jnp.float32)))
        return True
    except Exception:
        return False


@functools.lru_cache(maxsize=1)
def _vmem_budget_bytes():
    """Usable VMEM budget: physical capacity minus headroom (never exceed physical).
    ~56 MiB on v7x (64 MiB physical), ~112 MiB on v5e/v6e (128 MiB physical)."""
    try:
        cap = int(pltpu.get_tpu_info().vmem_capacity_bytes)
    except Exception:
        cap = 64 << 20          # conservative fallback (v7x physical VMEM)
    return min(cap * 7 // 8, cap - (8 << 20))


def _plan_tiles(M, K, D, in_bytes, out_bytes, tm_req, single_buf):
    """Pick (tm, tn) so double-buffered tiles + weight fit the VMEM budget.
    tn == D means the full (K, D) weight stays resident (no D tiling)."""
    budget = _vmem_budget_bytes()
    slack = 2 << 20             # internal scratch / semaphores / bias

    def est(tm_, tn_, w_bufs):
        return (2 * tm_ * K * in_bytes            # double-buffered patch tiles
                + 2 * tm_ * tn_ * out_bytes       # double-buffered output tiles
                + w_bufs * (K * tn_ * in_bytes + tn_ * 4)
                + slack)

    # --- M tile: multiple of 16, >= 2 grid steps, grown toward 1024 if VMEM allows
    #     (amortizes the ~0.35 us per-grid-step overhead). ---
    if M <= 16:
        tm = M                                    # tiny edge case: one full-extent block
    else:
        cap = _round_up(_cdiv(M, 2), 16)
        tm = max(16, min(_round_up(tm_req, 16), cap))
        if tm_req >= 512:
            while tm * 2 <= min(1024, cap) and est(tm * 2, min(D, 1024), 2) <= budget:
                tm *= 2

    # --- D tile: prefer keeping the whole (K, D) weight resident. ---
    w_bufs = 1 if single_buf else 2
    if est(tm, D, w_bufs) <= budget:
        return tm, D, est(tm, D, w_bufs)
    # Tile D (weight block now varies over the inner grid axis -> double-buffered).
    for tn in (1024, 512, 256, 128):
        if tn < D and est(tm, tn, 2) <= budget:
            return tm, tn, est(tm, tn, 2)
    # Last resort: shrink the M tile as well.
    tn = min(D, 128)
    while tm > 16 and est(tm, tn, 2) > budget:
        tm = max(16, _round_up(tm // 2, 16))
    return tm, tn, est(tm, tn, 2)


def prepare_token_embedding_params(weight, bias, *, compute_dtype=jnp.bfloat16):
    """Pre-transpose / lane-pad the Conv3d weight ONCE (hoists a full K*D HBM
    transpose out of the per-call path).  Returns (w2d, b2d, d_model) where
    w2d: (K, D) in compute_dtype, b2d: (1, D) f32, D = round_up(d_model, 128)."""
    d_model = weight.shape[0]
    K = int(math.prod(weight.shape[1:]))
    D = _round_up(d_model, 128)
    w2d = weight.reshape(d_model, K).T.astype(compute_dtype)   # (K, d_model)
    b2d = bias.reshape(1, d_model).astype(jnp.float32)
    if D != d_model:                                           # lane-dense output slab
        w2d = jnp.pad(w2d, ((0, 0), (0, D - d_model)))
        b2d = jnp.pad(b2d, ((0, 0), (0, D - d_model)))
    return w2d, b2d, d_model


def token_embedding(x, weight, bias, t_patch_size, patch_size, *,
                    d_model=None, tm=512, compute_dtype=jnp.bfloat16,
                    out_dtype=None):
    """x: (N, c_in, T, H, W).

    weight: either the raw Conv3d weight (d_model, c_in, tp, p, p) with bias (d_model,),
    or a pre-prepared (K, D) matrix from `prepare_token_embedding_params` (then pass
    its b2d and d_model).  Returns (N, T'*H'*W', d_model) == TokenEmbedding.forward.
    """
    N, C, T, H, W = x.shape
    tp, p = t_patch_size, patch_size
    Tp, Hp, Wp = T // tp, H // p, W // p
    K = C * tp * p * p
    M = N * Tp * Hp * Wp

    compute_dtype = jnp.dtype(x.dtype if compute_dtype is None else compute_dtype)
    out_dtype = jnp.dtype(compute_dtype if out_dtype is None else out_dtype)

    if weight.ndim == 5:
        w2d, b2d, d_model = prepare_token_embedding_params(
            weight, bias, compute_dtype=compute_dtype)
    else:
        if d_model is None:
            raise ValueError("pass d_model when using a pre-prepared (K, D) weight")
        w2d = weight.astype(compute_dtype)
        b2d = bias.reshape(1, -1).astype(jnp.float32) if bias.ndim == 1 else bias
    D = w2d.shape[1]
    assert w2d.shape[0] == K and b2d.shape == (1, D)

    # --- patch extraction (layout glue, materialized by XLA so the kernel's input DMA
    #     reads fully contiguous K-rows; K-ordering (C, tp, p, p) matches the weight) ---
    xp = x.reshape(N, C, Tp, tp, Hp, p, Wp, p)
    xp = xp.transpose(0, 2, 4, 6, 1, 3, 5, 7)                  # (N,T',H',W',C,tp,p,p)
    patches = xp.reshape(M, K).astype(compute_dtype)

    # --- tiling plan (VMEM-aware; may enable D tiling on v7x) ---
    in_bytes = compute_dtype.itemsize
    out_bytes = out_dtype.itemsize
    single_buf = _single_buffer_supported()
    tm, tn, vmem_est = _plan_tiles(M, K, D, in_bytes, out_bytes, tm, single_buf)

    grid_m = _cdiv(M, tm)
    grid_n = _cdiv(D, tn)
    # Keep grid_m even when possible: the parallel axis is sharded over v7x's 2 TCs.
    if grid_m > 1 and grid_m % 2 == 1:
        tm2 = _round_up(_cdiv(M, grid_m + 1), 16)
        if tm2 >= 16 and _cdiv(M, tm2) % 2 == 0:
            tm, grid_m = tm2, _cdiv(M, tm2)

    # Grid-invariant weight/bias (no D tiling): single-buffer if supported.
    inv_kwargs = ({"pipeline_mode": pl.Buffered(1)}
                  if (single_buf and grid_n == 1) else {})
    x_spec = pl.BlockSpec((tm, K), lambda i, j: (i, 0))        # resident across j
    w_spec = pl.BlockSpec((K, tn), lambda i, j: (0, j), **inv_kwargs)
    b_spec = pl.BlockSpec((1, tn), lambda i, j: (0, j), **inv_kwargs)
    o_spec = pl.BlockSpec((tm, tn), lambda i, j: (i, j))

    weight_passes = grid_m if grid_n > 1 else 1
    cost = pl.CostEstimate(
        flops=2 * M * K * D,
        transcendentals=0,
        bytes_accessed=(M * K * in_bytes + weight_passes * K * D * in_bytes
                        + D * 4 + M * D * out_bytes),
    )

    cp_kwargs = dict(dimension_semantics=("parallel", "parallel"))
    if vmem_est > (16 << 20):          # above the smallest default scoped VMEM limit
        cp_kwargs["vmem_limit_bytes"] = int(_vmem_budget_bytes())

    out = pl.pallas_call(
        _patch_embed_kernel,
        # Ragged M: no explicit pad / slice — OOB rows of the last block are dropped.
        out_shape=jax.ShapeDtypeStruct((M, D), out_dtype),
        grid=(grid_m, grid_n),
        in_specs=[x_spec, w_spec, b_spec],
        out_specs=o_spec,
        compiler_params=pltpu.CompilerParams(**cp_kwargs),
        cost_estimate=cost,
    )(patches, w2d, b2d)

    if D != d_model:
        out = out[:, :d_model]
    # (M, d_model) -> (N, T'*H'*W', d_model) == PyTorch output ordering.
    return out.reshape(N, Tp * Hp * Wp, d_model)


def _reference_conv3d(x, weight, bias, t_patch_size, patch_size):
    """Plain-JAX reference using a real 3D convolution (NCDHW / OIDHW)."""
    ks = (t_patch_size, patch_size, patch_size)
    y = lax.conv_general_dilated(
        x, weight, window_strides=ks, padding="VALID",
        dimension_numbers=("NCDHW", "OIDHW", "NCDHW"))
    y = y + bias.reshape(1, -1, 1, 1, 1)
    N, d_model, Tp, Hp, Wp = y.shape
    y = y.reshape(N, d_model, Tp, Hp * Wp)              # flatten(3)
    y = jnp.einsum("ncts->ntsc", y)                     # einsum
    return y.reshape(N, -1, d_model)                    # final reshape


if __name__ == "__main__":
    # Small shapes consistent with the module; M = N*T'*H'*W' = 80 also exercises
    # the ragged last M block (tm gets capped to 48 -> blocks of 48 + 32).
    N, c_in, d_model = 2, 4, 32
    t_patch_size, patch_size = 2, 2
    T, H, W = 4, 10, 8

    key = jax.random.PRNGKey(0)
    kx, kw, kb = jax.random.split(key, 3)

    x = jax.random.normal(kx, (N, c_in, T, H, W), dtype=jnp.float32)

    # Kaiming-normal (fan_in, leaky_relu a=0 -> gain=sqrt(2)) like the PyTorch init.
    fan_in = c_in * t_patch_size * patch_size * patch_size
    std = math.sqrt(2.0) / math.sqrt(fan_in)
    weight = std * jax.random.normal(
        kw, (d_model, c_in, t_patch_size, patch_size, patch_size), dtype=jnp.float32)
    # Conv3d default bias init: U(-1/sqrt(fan_in), 1/sqrt(fan_in)).
    bound = 1.0 / math.sqrt(fan_in)
    bias = jax.random.uniform(kb, (d_model,), minval=-bound, maxval=bound,
                              dtype=jnp.float32)

    ref = _reference_conv3d(x, weight, bias, t_patch_size, patch_size)
    expected_shape = (N,
                      (T // t_patch_size) * (H // patch_size) * (W // patch_size),
                      d_model)

    _single_buffer_supported()   # warm the (cached) capability probe eagerly

    # (a) exact-precision path (f32 compute) — tight correctness check, raw Conv3d weight.
    fwd_f32 = jax.jit(functools.partial(
        token_embedding, t_patch_size=t_patch_size, patch_size=patch_size,
        compute_dtype=jnp.float32))
    out_f32 = jax.block_until_ready(fwd_f32(x, weight, bias))
    assert out_f32.shape == ref.shape == expected_shape
    assert jnp.allclose(out_f32, ref, atol=1e-5, rtol=1e-5), "f32 mismatch vs conv3d reference"

    # (b) production path: bf16 compute / bf16 output, weight pre-transposed ONCE
    #     (hoisted out of the per-call path) — loose check.
    w2d, b2d, _ = prepare_token_embedding_params(weight, bias,
                                                 compute_dtype=jnp.bfloat16)
    fwd_bf16 = jax.jit(functools.partial(
        token_embedding, t_patch_size=t_patch_size, patch_size=patch_size,
        d_model=d_model))
    out_bf16 = jax.block_until_ready(fwd_bf16(x, w2d, b2d))
    assert out_bf16.shape == expected_shape
    assert out_bf16.dtype == jnp.bfloat16
    assert jnp.allclose(out_bf16.astype(jnp.float32), ref, atol=5e-2, rtol=5e-2), \
        "bf16 mismatch vs conv3d reference"

    print("KERNEL_OK")
</pallas_src>

<mosaic_0001>
module attributes {stable_mosaic.version = 11 : i64} {
  func.func @_probe_copy_kernel(%arg0: i32, %arg1: i32, %arg2: memref<8x128xf32, #tpu.memory_space<vmem>>, %arg3: memref<8x128xf32, #tpu.memory_space<vmem>>) attributes {dimension_semantics = [#tpu.dimension_semantics<arbitrary>, #tpu.dimension_semantics<arbitrary>], iteration_bounds = array<i64: 2, 1>, scalar_prefetch = 0 : i64, scratch_operands = 0 : i64, tpu.core_type = #tpu.core_type<tc>, window_params = [{pipeline_mode = #tpu.pipeline_mode<synchronous>, transform_indices = @transform_0, window_bounds = array<i64: 8, 128>}, {transform_indices = @transform_1, window_bounds = array<i64: 8, 128>}]} {
    %c0 = arith.constant 0 : index
    %c0_0 = arith.constant 0 : index
    %0 = vector.load %arg2[%c0, %c0_0] : memref<8x128xf32, #tpu.memory_space<vmem>>, vector<8x128xf32>
    %c0_1 = arith.constant 0 : index
    %c0_2 = arith.constant 0 : index
    %1 = vector.load %arg3[%c0_1, %c0_2] : memref<8x128xf32, #tpu.memory_space<vmem>>, vector<8x128xf32>
    tpu.vector_store %arg3[%c0_1, %c0_2], %0 {strides = array<i32>} : memref<8x128xf32, #tpu.memory_space<vmem>>, vector<8x128xf32>,
    return
  }
  func.func @transform_0(%arg0: i32, %arg1: i32) -> (i32, i32) {
    %c0_i32 = arith.constant 0 : i32
    %c0_i32_0 = arith.constant 0 : i32
    %c0_i32_1 = arith.constant 0 : i32
    return %c0_i32, %c0_i32_0 : i32, i32
  }
  func.func @transform_1(%arg0: i32, %arg1: i32) -> (i32, i32) {
    %c0_i32 = arith.constant 0 : i32
    %c0_i32_0 = arith.constant 0 : i32
    return %arg0, %c0_i32 : i32, i32
  }
}

module attributes {stable_mosaic.version = 11 : i64} {
  func.func @_patch_embed_kernel(%arg0: i32, %arg1: i32, %arg2: memref<48x32xf32, #tpu.memory_space<vmem>>, %arg3: memref<32x128xf32, #tpu.memory_space<vmem>>, %arg4: memref<1x128xf32, #tpu.memory_space<vmem>>, %arg5: memref<48x128xf32, #tpu.memory_space<vmem>>) attributes {dimension_semantics = [#tpu.dimension_semantics<parallel>, #tpu.dimension_semantics<parallel>], iteration_bounds = array<i64: 2, 1>, scalar_prefetch = 0 : i64, scratch_operands = 0 : i64, tpu.core_type = #tpu.core_type<tc>, window_params = [{transform_indices = @transform_0, window_bounds = array<i64: 48, 32>}, {transform_indices = @transform_1, window_bounds = array<i64: 32, 128>}, {transform_indices = @transform_2, window_bounds = array<i64: 1, 128>}, {transform_indices = @transform_3, window_bounds = array<i64: 48, 128>}]} {
    %c0 = arith.constant 0 : index
    %c0_0 = arith.constant 0 : index
    %0 = vector.load %arg2[%c0, %c0_0] : memref<48x32xf32, #tpu.memory_space<vmem>>, vector<48x32xf32>
    %c0_1 = arith.constant 0 : index
    %c0_2 = arith.constant 0 : index
    %1 = vector.load %arg3[%c0_1, %c0_2] : memref<32x128xf32, #tpu.memory_space<vmem>>, vector<32x128xf32>
    %cst = arith.constant dense<0.000000e+00> : vector<48x128xf32>
    %2 = tpu.matmul %0, %1, %cst {dimension_numbers = #tpu.dot_dimension_numbers<[1], [0], [0], [1], [0, 0, 1, 1], [], []>} : vector<48x32xf32>, vector<32x128xf32>, vector<48x128xf32> -> vector<48x128xf32>
    %c0_3 = arith.constant 0 : index
    %c0_4 = arith.constant 0 : index
    %3 = vector.load %arg4[%c0_3, %c0_4] : memref<1x128xf32, #tpu.memory_space<vmem>>, vector<1x128xf32>
    %4 = vector.broadcast %3 : vector<1x128xf32> to vector<48x128xf32>
    %5 = arith.addf %2, %4 : vector<48x128xf32>
    %c0_5 = arith.constant 0 : index
    %c0_6 = arith.constant 0 : index
    %6 = vector.load %arg5[%c0_5, %c0_6] : memref<48x128xf32, #tpu.memory_space<vmem>>, vector<48x128xf32>
    tpu.vector_store %arg5[%c0_5, %c0_6], %5 {strides = array<i32>} : memref<48x128xf32, #tpu.memory_space<vmem>>, vector<48x128xf32>,
    return
  }
  func.func @transform_0(%arg0: i32, %arg1: i32) -> (i32, i32) {
    %c0_i32 = arith.constant 0 : i32
    %c0_i32_0 = arith.constant 0 : i32
    return %arg0, %c0_i32 : i32, i32
  }
  func.func @transform_1(%arg0: i32, %arg1: i32) -> (i32, i32) {
    %c0_i32 = arith.constant 0 : i32
    %c0_i32_0 = arith.constant 0 : i32
    return %c0_i32, %arg1 : i32, i32
  }
  func.func @transform_2(%arg0: i32, %arg1: i32) -> (i32, i32) {
    %c0_i32 = arith.constant 0 : i32
    %c0_i32_0 = arith.constant 0 : i32
    return %c0_i32, %arg1 : i32, i32
  }
  func.func @transform_3(%arg0: i32, %arg1: i32) -> (i32, i32) {
    %c0_i32 = arith.constant 0 : i32
    return %arg0, %arg1 : i32, i32
  }
}

</mosaic_0001>

<bundles_post_ra>
// kernel: tpu_custom_call.1
= control target key start
LH: loop header
LB: loop body
LE: loop exit
PB: predicated region body
PF: predicated region fallthrough
CT: control target
= control target key end

     0   :  { %6 = vsyncpa [#allocation3], 0  ;;  %s546_s0 = inlined_call_operand.hbm [shape: f32[8,128], index: 0, kind: input, shape index: {}]   ;;  %s547_s1 = inlined_call_operand.hbm [shape: f32[16,128], index: 1, kind: output, shape index: {}]  }
   0x1   :  { %7 = vsyncpa [#allocation4], 0 }
   0x2   :  { %9 = vsyncpa [#allocation4 + $0x1], 0  ;;  %s401_s6 = smov 0   ;;  %s403_s7 = smov 0  }
   0x3   :  { %s405_s8 = smov 0   ;;  %s407_s9 = smov 0  }
   0x4   :  { %s409_s10 = smov 0   ;;  %s411_s11 = smov 0  }
   0x5 LB: > { %s200_s12 = sadd.s32 4294967295, %s387_s11   ;;  %s201_s13 = sadd.s32 4294967294, %s387_s11   ;;  %s387_s11 = sphi %s411_s11, %s15_s11   ;;  %s383_s10 = sphi %s409_s10, %s565_s10   ;;  %s379_s9 = sphi %s407_s9, %s564_s9   ;;  %s375_s8 = sphi %s405_s8, %s563_s8   ;;  %s371_s7 = sphi %s403_s7, %s562_s7   ;;  %s367_s6 = sphi %s401_s6, %s561_s6  }
   0x6   : > { %s27_s14 = sadd.s32 1, %s383_s10  ;;  %s55_s15 = sadd.s32 1, %s375_s8 }
   0x7   : > { %p29_p0 = scmp.ge.s32.totalorder %s27_s14, 2  ;;  %p65_p1 = scmp.ne.s32.totalorder %s375_s8, %s371_s7 }
   0x8   : > { %p66_p2 = scmp.eq.s32.totalorder %s200_s12, 1  ;;  %p71_p3 = scmp.ne.s32.totalorder %s371_s7, %s367_s6 }
   0x9   : > { %s567_s14 = smov (%p29_p0, %s27_s14), 0  ;;  %p72_p5 = scmp.eq.s32.totalorder %s201_s13, 1 }
   0xa   : > { %p441_p4 = por %p66_p2, %p65_p1  ;;  %s52_s17 = ssub.s32 %s383_s10, %s567_s14 }
   0xb   : > { %p202_p6 = scmp.ge.s32.totalorder %s387_s11, 1  ;;  %p53_p7 = scmp.eq.s32.totalorder %s52_s17, 0 }
   0xc   : > { %s552_s16 = scalar_select %p441_p4, 1, 0 }
   0xd   : > { %p448_p8 = por %p72_p5, %p71_p3  ;;  %p79_p9 = scmp.lt.s32.totalorder %s387_s11, 3 }
   0xe   : > { %s454_s19 = scalar_select %p53_p7, %s375_s8, %s55_s15  }
   0xf   : > { %s553_s18 = scalar_select %p448_p8, 1, 0 }
  0x10   : > { %p456_p10 = pnand %p202_p6, %p79_p9  ;;  %p460_p11 = scmp.eq.s32.totalorder %s200_s12, 0 }
  0x11   : > { %s389_s22 = smov [#allocation2]   ;;  %s277_s27 = scalar_lea.hbm %s546_s0, 128 }
  0x12   : > { %s554_s20 = scalar_select %p456_p10, 1, 0 }
  0x13   : > { %s555_s21 = scalar_select %p460_p11, 1, 0 }
  0x14   : > { %p217_p12 = pneg %p456_p10  ;;  %s92_s23 = sshll.u32 %s389_s22, 4  ;;  %s93_s23 = int_to_ptr.vmem [resolvable:$true] %s92_s23 }
  0x15   : > { %p278_p0 = scmp.ne.s32.totalorder %s546_s0, %s277_s27  ;;  %p284_p5 = scmp.lt.u32.totalorder %s277_s27, %s546_s0 }
  0x16   : > { %p468_p13 = pnand %p460_p11, %p217_p12 }
  0x18   : > { %p279_p1 = pneg %p468_p13 }
  0x1a   : > { %p280_p2 = pnand %p279_p1, %p278_p0 }
  0x1c   : > { %p281_p3 = pneg %p280_p2 }
  0x1e   : > { %p286_p6 = pnand %p284_p5, %p281_p3 }
  0x20   : > { %289 = shalt.err (!%p286_p6)
}
  0x21   : > { %s290_s3 = scalar_lea.vmem %s93_s23, 128  ;;  %p298_p8 = scmp.lt.s32.totalorder %s93_s23, %s93_s23 }
  0x22   : > { %p291_p7 = scmp.ne.s32.totalorder %s93_s23, %s290_s3  ;;  %p299_p4 = scmp.lt.s32.totalorder %s290_s3, %s290_s3 }
  0x24   : > { %p293_p9 = pnand %p291_p7, %p279_p1  ;;  %p300_p11 = por %p299_p4, %p298_p8 }
  0x26   : > { %p294_p12 = pneg %p293_p9 }
  0x28   : > { %p301_p10 = pnand %p300_p11, %p294_p12 }
  0x2a   : > { %304 = shalt.err (!%p301_p10)
}
  0x2b   : > { %220 = dma.hbm_to_vmem [thread:$0]  (!%p468_p13), %s546_s0, 128, %s93_s23, [#allocation3]  }
  0x2c   : > { %p557_p0 = scmp.ne.s32.totalorder %s554_s20, 0 }
  0x2d   : > { %p558_p2 = scmp.ne.s32.totalorder (!%p557_p0), %s555_s21, 0 }
  0x2e   : > { %105 = sbr.rel (%p557_p0) target bundleno = 80 (0x50), region = 24 }
  0x35   : > { %358 = dma.done.wait (%p558_p2), [#allocation3], 128  }
  0x36   : > { %360 = vsyncadd (%p558_p2), [#allocation3], 4294967168  ;;  %s117_s12 = sand.u32 1, %s371_s7   ;;  %s208_s22 = sshll.u32 %s379_s9, 7  ;;  %v120_v0 = vld [vmem:[#allocation2] sm:$0xff] }
  0x37   : > { %s206_s13 = sshll.u32 %s117_s12, 3  ;;  %s501_s20 = scalar_lea.hbm %s547_s1, %s208_s22 }
  0x38   : > { %s119_s15 = scalar_lea.vmem [#allocation5], %s206_s13  ;;  %s123_s21 = scalar_lea.sflag [#allocation4], %s117_s12 }
  0x39   : > { %s136_s17 = sshll.u32 %s119_s15, 4  ;;  %121 = vst [vmem:[%s119_s15] sm:$0xff] %v120_v0  ;;  %p559_p8 = scmp.ne.s32.totalorder %s552_s16, 0  ;;  %s496_s17 = int_to_ptr.vmem [resolvable:$true] %s136_s17 }
  0x3a   : > { %s305_s25 = scalar_lea.vmem %s496_s17, 128  ;;  %s390_s26 = smov [#allocation5]  }
  0x3b   : > { %p306_p4 = scmp.ne.s32.totalorder %s496_s17, %s305_s25  ;;  %s309_s9 = sshll.u32 %s390_s26, 4  ;;  %s310_s9 = int_to_ptr.vmem [resolvable:$false] %s309_s9 }
  0x3c   : > { %s311_s27 = scalar_lea.vmem %s310_s9, 256  ;;  %p312_p13 = scmp.lt.s32.totalorder %s496_s17, %s310_s9 }
  0x3d   : > { %p307_p10 = pnand %p306_p4, %p559_p8  ;;  %p313_p1 = scmp.lt.s32.totalorder %s311_s27, %s305_s25 }
  0x3f   : > { %p308_p11 = pneg %p307_p10  ;;  %p314_p3 = por %p313_p1, %p312_p13 }
  0x41   : > { %p315_p5 = pnand %p314_p3, %p308_p11 }
  0x43   : > { %318 = shalt.err (!%p315_p5)
}
  0x44   : > { %s319_s28 = scalar_lea.hbm %s501_s20, 128  ;;  %s323_s2 = scalar_lea.hbm %s547_s1, 256 }
  0x45   : > { %p320_p6 = scmp.ne.s32.totalorder %s501_s20, %s319_s28  ;;  %p324_p12 = scmp.lt.u32.totalorder %s501_s20, %s547_s1 }
  0x46   : > { %p325_p0 = scmp.lt.u32.totalorder %s323_s2, %s319_s28  ;;  %p327_p4 = scmp.lt.u32.totalorder %s319_s28, %s501_s20 }
  0x47   : > { %p321_p7 = pnand %p320_p6, %p559_p8 }
  0x48   : > { %p326_p2 = por %p325_p0, %p324_p12 }
  0x49   : > { %p322_p9 = pneg %p321_p7 }
  0x4a   : > { %p328_p10 = por %p327_p4, %p326_p2 }
  0x4c   : > { %p329_p11 = pnand %p328_p10, %p322_p9 }
  0x4e   : > { %332 = shalt.err (!%p329_p11)
}
  0x4f   : > { %215 = dma.vmem_to_hbm [thread:$0]  (%p559_p8), %s496_s17, 128, %s501_s20, %s123_s21  }
  0x50 PF: > { %p227_p13 = scmp.ge.s32.totalorder %s387_s11, 2  ;;  %s148_s5 = sand.u32 1, %s367_s6  }
  0x51   : > { %p560_p1 = scmp.ne.s32.totalorder %s553_s18, 0  ;;  %s149_s12 = scalar_lea.sflag [#allocation4], %s148_s5 }
  0x53   : > { %p222_p3 = pnand %p227_p13, %p560_p1 }
  0x55   : > { %362 = dma.done.wait (!%p222_p3), %s149_s12, 128  }
  0x56   : > { %364 = vsyncadd (!%p222_p3), %s149_s12, 4294967168  ;;  %s15_s11 = sadd.s32 1, %s387_s11   ;;  %s561_s6 = smov %s371_s7 }
  0x57   : > { %p12_p5 = scmp.ge.s32.totalorder %s15_s11, 4   ;;  %s562_s7 = smov %s375_s8 }
  0x58   : > { %s563_s8 = smov %s454_s19  ;;  %s564_s9 = smov %s383_s10 }
  0x59   : > { %s565_s10 = smov %s567_s14  ;;  %14 = sbr.rel (!%p12_p5) target bundleno = 5 (0x5), region = 61 }
  0x60   :  { %154 = vsyncpa [#allocation3], 1 }
  0x61   :  { %156 = vsyncpa [#allocation3 + $0x1], 1 }
  0x62   :  { %157 = vsyncpa [#allocation4], 1 }
  0x63   :  { %159 = vsyncpa [#allocation4 + $0x1], 1 }

// kernel: token_embedding.1
= control target key start
LH: loop header
LB: loop body
LE: loop exit
PB: predicated region body
PF: predicated region fallthrough
CT: control target
= control target key end

     0   :  { %s950_s12 = smov 0   ;;  %s952_s13 = smov 0   ;;  %s1086_s0 = inlined_call_operand.vmem [shape: f32[80,32], index: 0, kind: input, shape index: {}]   ;;  %s1087_s1 = inlined_call_operand.vmem [shape: f32[32,128], index: 1, kind: input, shape index: {}]   ;;  %s1088_s2 = inlined_call_operand.vmem [shape: f32[1,128], index: 2, kind: input, shape index: {}]   ;;  %s1089_s3 = inlined_call_operand.vmem [shape: f32[80,128], index: 3, kind: output, shape index: {}]  }
   0x1   :  { %s954_s14 = smov 0   ;;  %s956_s15 = smov 0  }
   0x2   :  { %s958_s16 = smov 0  }
   0x3 LB: > { %s649_s17 = sadd.s32 4294967295, %s896_s16   ;;  %s25_s18 = sadd.s32 1, %s892_s15  ;;  %s896_s16 = sphi %s958_s16, %s13_s16   ;;  %s892_s15 = sphi %s956_s15, %s1097_s15   ;;  %s888_s14 = sphi %s954_s14, %s1096_s14   ;;  %s884_s13 = sphi %s952_s13, %s1095_s13   ;;  %s880_s12 = sphi %s950_s12, %s1094_s12  }
   0x4   : > { %p27_p0 = scmp.ge.s32.totalorder %s25_s18, 2  ;;  %s112_s19 = sadd.s32 1, %s884_s13 }
   0x5   : > { %p122_p1 = scmp.ne.s32.totalorder %s884_s13, %s880_s12  ;;  %p123_p2 = scmp.eq.s32.totalorder %s649_s17, 1 }
   0x6   : > { %s1099_s18 = smov (%p27_p0, %s25_s18), 0  ;;  %p655_p4 = scmp.ge.s32.totalorder %s896_s16, 1 }
   0x7   : > { %p982_p3 = por %p123_p2, %p122_p1  ;;  %s107_s21 = ssub.s32 %s892_s15, %s1099_s18 }
   0x8   : > { %p177_p5 = scmp.lt.s32.totalorder %s896_s16, 3  ;;  %p110_p6 = scmp.eq.s32.totalorder %s107_s21, 0 }
   0xa   : > { %p178_p7 = pnand %p655_p4, %p177_p5 }
   0xb   : > { %s991_s22 = scalar_select %p110_p6, %s884_s13, %s112_s19  }
   0xc   : > { %181 = sbr.rel (%p178_p7) target bundleno = 306 (0x132), region = 32  ;;  %v243_v0 = vld [vmem:[%s1087_s1] sm:$0xff] (!%p178_p7)  ;;  %v244_v1 = vld [vmem:[%s1087_s1 + $0x8] sm:$0xff] (!%p178_p7)  ;;  %v245_v2 = vld [vmem:[%s1087_s1 + $0x10] sm:$0xff] (!%p178_p7)  ;;  %vm254_vm0 = vcmask (!%p178_p7), 261120   ;;  %s208_s10 = sand.u32 (!%p178_p7), 1, %s880_s12  }
   0xd   : > { %s1003_s29 = smul.u32 (!%p178_p7), 6, %s888_s14  ;;  %v704_v3 = vpack.c.bf16 (!%p178_p7), %v244_v1, %v243_v0  ;;  %v246_v4 = vld [vmem:[%s1087_s1 + $0x18] sm:$0xff] (!%p178_p7)  ;;  %v657_v12 = vld [vmem:[%s1088_s2] ss:$0 sm:$0xff] (!%p178_p7) }
   0xe   : > { %v708_v5 = vpack.c.bf16 (!%p178_p7), %v246_v4, %v245_v2  ;;  %s716_s11 = smul.u32 (!%p178_p7), 48, %s208_s10 }
   0xf   : > { %p216_p8 = scmp.lt.s32.totalorder (!%p178_p7), %s1003_s29, 9  ;;  %712 = vmatprep.subr.bf16.mxu1 (!%p178_p7), %v704_v3  ;;  %705 = vmatprep.subr.bf16.mxu0 (!%p178_p7), %v704_v3 }
  0x10   : > { %714 = vmatpush3.bf16.msra.mxu1 (!%p178_p7), %v704_v3  ;;  %707 = vmatpush3.bf16.msra.mxu0 (!%p178_p7), %v704_v3  ;;  %s1017_s21 = scalar_lea.vmem (!%p178_p7), [#allocation2], %s716_s11  }
  0x11   : > { %713 = vmatprep.subr.bf16.mxu1 (!%p178_p7), %v708_v5  ;;  %709 = vmatprep.subr.bf16.mxu0 (!%p178_p7), %v708_v5 }
  0x13   : > { %s217_s5 = scalar_select %p216_p8, %s1003_s29, 9 }
  0x14   : > { %715 = vmatpush3.bf16.msra.mxu1 %v708_v5  ;;  %711 = vmatpush3.bf16.msra.mxu0 %v708_v5  ;;  %s382_s12 = ssub.s32 (%p982_p3), 10, %s1003_s29  ;;  %s676_s23 = smul.u32 (%p982_p3), 48, %s888_s14 }
  0x15   : > { %s656_s6 = sshll.u32 %s217_s5, 3  ;;  %p383_p9 = scmp.lt.s32.totalorder (%p982_p3), %s382_s12, 6 }
  0x16   : > { %s219_s9 = scalar_lea.vmem %s1086_s0, %s656_s6  ;;  %s1032_s26 = scalar_lea.vmem (%p982_p3), %s1089_s3, %s676_s23  }
  0x17   : > { %v239_v6 = vld [vmem:[%s219_s9 + $0x10] sm:$0xff]  ;;  %v240_v7 = vld [vmem:[%s219_s9 + $0x18] sm:$0xff]  ;;  %v237_v8 = vld [vmem:[%s219_s9] sm:$0xff] }
  0x18   : > { %698 = vmatprep.mubr.msk.f32.mxu1 %vm254_vm0, %v239_v6  ;;  %695 = vmatprep.mubr.msk.f32.mxu0 %vm254_vm0, %v237_v8  ;;  %v238_v9 = vld [vmem:[%s219_s9 + $0x8] sm:$0xff]  ;;  %v241_v10 = vld [vmem:[%s219_s9 + $0x20] sm:$0xff] }
  0x19   : > { %699 = vmatmul.mubr.msk.f32.vlgmr.msra.gmra.mrb[0].mxu1 %vm254_vm0, %v240_v7  ;;  %696 = vmatmul.mubr.msk.f32.vlgmr.msra.gmra.mrb[0].mxu0 %vm254_vm0, %v238_v9  ;;  %v242_v11 = vld [vmem:[%s219_s9 + $0x28] sm:$0xff] }
  0x1a   : > { %701 = vmatprep.mubr.msk.f32.mxu1 %vm254_vm0, %v241_v10 }
  0x1d   : > { %702 = vmatmul.mubr.msk.f32.gmra.mrb[2].mxu1 %vm254_vm0, %v242_v11 }
  0xec   : > { %v700_v13 = vpop.f32.mrb[0].mxu1  ;;  %v697_v14 = vpop.f32.mrb[0].mxu0 }
  0xed   : > { %v355_v15 = vadd.f32 %v700_v13, %v657_v12  ;;  %v349_v16 = vpop.f32.mrb[1].mxu1  ;;  %v345_v17 = vadd.f32 %v697_v14, %v657_v12  ;;  %v339_v18 = vpop.f32.mrb[1].mxu0 }
  0xee   : > { %v350_v19 = vadd.f32 %v657_v12, %v349_v16  ;;  %v340_v20 = vadd.f32 %v657_v12, %v339_v18  ;;  %380 = sbr.rel (!%p982_p3) target bundleno = 306 (0x132), region = 36 }
  0xef   : > { %371 = vst [vmem:[%s1017_s21 + $0x18] sm:$0xff] %v355_v15  ;;  %369 = vst [vmem:[%s1017_s21 + $0x8] sm:$0xff] %v345_v17 }
  0xf0   : > { %370 = vst [vmem:[%s1017_s21 + $0x10] sm:$0xff] %v350_v19  ;;  %368 = vst [vmem:[%s1017_s21] sm:$0xff] %v340_v20  ;;  %v703_v21 = vpop.f32.mrb[2].mxu1 }
  0xf1   : > { %v365_v22 = vadd.f32 %v703_v21, %v657_v12  ;;  %v359_v23 = vpop.f32.mrb[3].mxu1 }
  0xf2   : > { %v360_v24 = vadd.f32 %v657_v12, %v359_v23 }
  0xf3   : > { %373 = vst [vmem:[%s1017_s21 + $0x28] sm:$0xff] %v365_v22 }
  0xf4   : > { %372 = vst [vmem:[%s1017_s21 + $0x20] sm:$0xff] %v360_v24 }
  0xf5   : > { %s1101_s12 = smov (!%p383_p9, %s382_s12), 6 }
  0xf6   : > { %s664_s27 = sshll.u32 %s1101_s12, 7 }
  0xf7   : > { %p667_p10 = scmp.eq.s32.totalorder %s664_s27, 0 }
  0xf8   : > { %822 = sdivrem.u32 (!%p667_p10), %s1101_s12, 6 }
  0xf9   : > { %392 = sbr.rel (%p667_p10) target bundleno = 306 (0x132), region = 40 }
 0x101   : > { %s1038_s20 = spop.drf %822 }
 0x102   : > { %p668_p11 = scmp.le.s32.totalorder %s1038_s20, 0 }
 0x103   : > { %s1091_s14 = smov (!%p668_p11), %s1032_s26  ;;  %s1092_s28 = smov (!%p668_p11), %s1017_s21 }
 0x104   : > { %579 = sbr.rel (%p668_p11) target bundleno = 277 (0x115), region = 122  ;;  %s1047_s29 = smov (!%p668_p11), 0  }
 0x105   : > { %s1049_s30 = smov (!%p668_p11), 0  }
 0x10b LB: >> { %v466_v25 = vld [vmem:[%s904_s28] sm:$0xff]  ;;  %v468_v26 = vld [vmem:[%s904_s28 + $0x8] sm:$0xff]  ;;  %v470_v27 = vld [vmem:[%s904_s28 + $0x10] sm:$0xff]  ;;  %s478_s4 = sadd.s32 1, %s908_s29  ;;  %s460_s30 = sadd.s32 1, %s912_s30   ;;  %s912_s30 = sphi %s1049_s30, %s460_s30   ;;  %s908_s29 = sphi %s1047_s29, %s1093_s29   ;;  %s904_s28 = sphi %s1092_s28, %s483_s28   ;;  %s900_s14 = sphi %s1091_s14, %s484_s14  }
 0x10c   : >> { %467 = vst [vmem:[%s900_s14] sm:$0xff] %v466_v25  ;;  %469 = vst [vmem:[%s900_s14 + $0x8] sm:$0xff] %v468_v26  ;;  %v472_v28 = vld [vmem:[%s904_s28 + $0x18] sm:$0xff]  ;;  %v474_v29 = vld [vmem:[%s904_s28 + $0x20] sm:$0xff]  ;;  %p479_p12 = scmp.ge.s32.totalorder %s478_s4, %s1038_s20  ;;  %p459_p13 = scmp.ge.s32.totalorder %s460_s30, %s1038_s20 }
 0x10d   : >> { %471 = vst [vmem:[%s900_s14 + $0x10] sm:$0xff] %v470_v27  ;;  %v476_v30 = vld [vmem:[%s904_s28 + $0x28] sm:$0xff]  ;;  %473 = vst [vmem:[%s900_s14 + $0x18] sm:$0xff] %v472_v28 }
 0x10e   : >> { %475 = vst [vmem:[%s900_s14 + $0x20] sm:$0xff] %v474_v29  ;;  %477 = vst [vmem:[%s900_s14 + $0x28] sm:$0xff] %v476_v30  ;;  %s1103_s4 = smov (%p479_p12, %s478_s4), 0  ;;  %462 = sbr.rel (!%p459_p13) target bundleno = 267 (0x10b), region = 128 }
 0x10f   : >> { %s481_s5 = smul.u32 48, %s1103_s4  ;;  %s1093_s29 = smov %s1103_s4 }
 0x111   : >> { %s483_s28 = scalar_lea.vmem %s1017_s21, %s481_s5 [#allocation2]   ;;  %s484_s14 = scalar_lea.vmem %s1032_s26, %s481_s5  }
 0x115 PF: > { %824 = sdivrem.u32 %s1101_s12, 6 }
 0x116   : > { %s669_s6 = smul.u32 48, %s1038_s20 }
 0x118   : > { %s489_s7 = scalar_lea.vmem %s1017_s21, %s669_s6 [#allocation2]   ;;  %s491_s8 = scalar_lea.vmem %s1032_s26, %s669_s6  }
 0x11e   : > { %s825_s9 = spop.drf %824 }
 0x11f   : > { %p671_p0 = scmp.le.s32.totalorder %s825_s9, 0 }
 0x120   : > { %s914_s10 = smov (!%p671_p0), %s491_s8   ;;  %s918_s11 = smov (!%p671_p0), %s489_s7  }
 0x121   : > { %593 = sbr.rel (%p671_p0) target bundleno = 306 (0x132), region = 133  ;;  %s922_s17 = smov (!%p671_p0), 0  }
 0x122   : > { %s926_s19 = smov (!%p671_p0), 0  }
 0x128 LB: >> { %v501_v31 = vld [vmem:[%s920_s11] sm:$0xff]  ;;  %s503_s23 = sadd.s32 1, %s924_s17  ;;  %s495_s19 = sadd.s32 1, %s928_s19   ;;  %s928_s19 = sphi %s926_s19, %s495_s19   ;;  %s924_s17 = sphi %s922_s17, %s923_s17   ;;  %s920_s11 = sphi %s918_s11, %s508_s11   ;;  %s916_s10 = sphi %s914_s10, %s509_s10  }
 0x129   : >> { %502 = vst [vmem:[%s916_s10] sm:$0xff] %v501_v31  ;;  %p504_p1 = scmp.ge.s32.totalorder %s503_s23, %s825_s9  ;;  %p494_p2 = scmp.ge.s32.totalorder %s495_s19, %s825_s9 }
 0x12b   : >> { %s1105_s23 = smov (%p504_p1, %s503_s23), 0  ;;  %497 = sbr.rel (!%p494_p2) target bundleno = 296 (0x128), region = 139 }
 0x12c   : >> { %s672_s21 = sshll.u32 %s1105_s23, 3  ;;  %s923_s17 = smov %s1105_s23  }
 0x12d   : >> { %s508_s11 = scalar_lea.vmem %s489_s7, %s672_s21 [#allocation2]   ;;  %s509_s10 = scalar_lea.vmem %s491_s8, %s672_s21  }
 0x132 PF: > { %s13_s16 = sadd.s32 1, %s896_s16   ;;  %s1094_s12 = smov %s884_s13 }
 0x133   : > { %p10_p3 = scmp.ge.s32.totalorder %s13_s16, 4   ;;  %s1095_s13 = smov %s991_s22 }
 0x134   : > { %s1096_s14 = smov %s892_s15  ;;  %s1097_s15 = smov %s1099_s18 }
 0x135   :  { %12 = sbr.rel (!%p10_p3) target bundleno = 3 (0x3), region = 150 }

</bundles_post_ra>
